<compile_context>
chip_gen: v7x
topology: tpu7x:2x2x1
jax: 0.10.0
libtpu: 0.0.40
codegen_flags: <defaults>
</compile_context>

<pallas_src>
import jax
import jax.numpy as jnp
from jax.experimental import pallas as pl
from jax.experimental.pallas import tpu as pltpu


def _fused_kernel(x1_ref, x2_ref, x3_ref, w1_ref, b1_ref, w2_ref, b2_ref,
                  out_ref):
    # All refs live in SMEM; pure scalar path (no vector unit work at all).
    x1 = x1_ref[0]
    x2 = x2_ref[0]
    x3 = x3_ref[0]
    w1 = w1_ref[0]
    b1 = b1_ref[0]
    w2 = w2_ref[0]
    b2 = b2_ref[0]
    # v1 = x1*w1 + b1 ; v2 = x2*w2 + b2 ; v3 = v1 - x3 ; v4 = v2 - v3
    out_ref[0, 0] = (x2 * w2 + b2) - ((x1 * w1 + b1) - x3)


def model_forward(x1, x2, x3, w1, b1, w2, b2):
    # (1,1) -> (1,) is a free bitcast; keeps every SMEM operand 1-D and tiny.
    args = tuple(a.reshape((1,)) for a in (x1, x2, x3, w1, b1, w2, b2))
    return pl.pallas_call(
        _fused_kernel,
        out_shape=jax.ShapeDtypeStruct((1, 1), jnp.float32),
        grid=(),
        in_specs=[pl.BlockSpec(memory_space=pltpu.MemorySpace.SMEM)] * 7,
        out_specs=pl.BlockSpec(memory_space=pltpu.MemorySpace.SMEM),
    )(*args)


# NOTE: for real Linear shapes (N>1, features>1) this scalar formulation must
# be replaced with jnp.dot on (8,128)-aligned VMEM tiles; valid here for 1x1.
def reference_forward(x1, x2, x3, w1, b1, w2, b2):
    v1 = x1 @ w1.T + b1
    v2 = x2 @ w2.T + b2
    v3 = v1 - x3
    return v2 - v3


if __name__ == "__main__":
    key = jax.random.PRNGKey(0)
    k1, k2, k3, kw1, kb1, kw2, kb2 = jax.random.split(key, 7)

    # Inputs: shape (1, 1) as in the PyTorch script
    x1 = jax.random.normal(k1, (1, 1), dtype=jnp.float32)
    x2 = jax.random.normal(k2, (1, 1), dtype=jnp.float32)
    x3 = jax.random.normal(k3, (1, 1), dtype=jnp.float32)

    # Deterministic Linear(1,1) parameters (weight (out,in)=(1,1), bias (1,1))
    bound = 1.0  # 1/sqrt(in_features) = 1
    w1 = jax.random.uniform(kw1, (1, 1), jnp.float32, -bound, bound)
    b1 = jax.random.uniform(kb1, (1, 1), jnp.float32, -bound, bound)
    w2 = jax.random.uniform(kw2, (1, 1), jnp.float32, -bound, bound)
    b2 = jax.random.uniform(kb2, (1, 1), jnp.float32, -bound, bound)

    fwd = jax.jit(model_forward)
    out = fwd(x1, x2, x3, w1, b1, w2, b2)
    out = jax.block_until_ready(out)

    ref = reference_forward(x1, x2, x3, w1, b1, w2, b2)
    assert out.shape == (1, 1)
    assert jnp.allclose(out, ref, atol=1e-6, rtol=1e-5)

    print("KERNEL_OK")
</pallas_src>

<mosaic_0001>
module attributes {stable_mosaic.version = 11 : i64} {
  func.func @_fused_kernel(%arg0: memref<1xf32, #tpu.memory_space<smem>>, %arg1: memref<1xf32, #tpu.memory_space<smem>>, %arg2: memref<1xf32, #tpu.memory_space<smem>>, %arg3: memref<1xf32, #tpu.memory_space<smem>>, %arg4: memref<1xf32, #tpu.memory_space<smem>>, %arg5: memref<1xf32, #tpu.memory_space<smem>>, %arg6: memref<1xf32, #tpu.memory_space<smem>>, %arg7: memref<1x1xf32, #tpu.memory_space<smem>>) attributes {dimension_semantics = [], scalar_prefetch = 0 : i64, scratch_operands = 0 : i64, tpu.core_type = #tpu.core_type<tc>} {
    %c0 = arith.constant 0 : index
    %0 = memref.load %arg0[%c0] : memref<1xf32, #tpu.memory_space<smem>>
    %c0_0 = arith.constant 0 : index
    %1 = memref.load %arg1[%c0_0] : memref<1xf32, #tpu.memory_space<smem>>
    %c0_1 = arith.constant 0 : index
    %2 = memref.load %arg2[%c0_1] : memref<1xf32, #tpu.memory_space<smem>>
    %c0_2 = arith.constant 0 : index
    %3 = memref.load %arg3[%c0_2] : memref<1xf32, #tpu.memory_space<smem>>
    %c0_3 = arith.constant 0 : index
    %4 = memref.load %arg4[%c0_3] : memref<1xf32, #tpu.memory_space<smem>>
    %c0_4 = arith.constant 0 : index
    %5 = memref.load %arg5[%c0_4] : memref<1xf32, #tpu.memory_space<smem>>
    %c0_5 = arith.constant 0 : index
    %6 = memref.load %arg6[%c0_5] : memref<1xf32, #tpu.memory_space<smem>>
    %7 = arith.mulf %1, %5 : f32
    %8 = arith.addf %7, %6 : f32
    %9 = arith.mulf %0, %3 : f32
    %10 = arith.addf %9, %4 : f32
    %11 = arith.subf %10, %2 : f32
    %12 = arith.subf %8, %11 : f32
    %c0_6 = arith.constant 0 : index
    %c0_7 = arith.constant 0 : index
    %13 = memref.load %arg7[%c0_6, %c0_7] : memref<1x1xf32, #tpu.memory_space<smem>>
    memref.store %12, %arg7[%c0_6, %c0_7] : memref<1x1xf32, #tpu.memory_space<smem>>
    return
  }
}

</mosaic_0001>

<bundles_post_ra>
// kernel: model_forward.1
= control target key start
LH: loop header
LB: loop body
LE: loop exit
PB: predicated region body
PF: predicated region fallthrough
CT: control target
= control target key end

     0   :  { %19 = vsyncpa [#allocation10], 0  ;;  %s149_s0 = inlined_call_operand.<no memory space> [shape: f32[1], index: 0, kind: input, shape index: {}]   ;;  %s150_s1 = inlined_call_operand.<no memory space> [shape: f32[1], index: 1, kind: input, shape index: {}]   ;;  %s151_s2 = inlined_call_operand.<no memory space> [shape: f32[1], index: 2, kind: input, shape index: {}]   ;;  %s152_s3 = inlined_call_operand.<no memory space> [shape: f32[1], index: 3, kind: input, shape index: {}]   ;;  %s153_s4 = inlined_call_operand.<no memory space> [shape: f32[1], index: 4, kind: input, shape index: {}]   ;;  %s154_s5 = inlined_call_operand.<no memory space> [shape: f32[1], index: 5, kind: input, shape index: {}]   ;;  %s155_s6 = inlined_call_operand.<no memory space> [shape: f32[1], index: 6, kind: input, shape index: {}]   ;;  %s156_s7 = inlined_call_operand.hbm [shape: f32[1,1], index: 7, kind: output, shape index: {}]  }
   0x1   :  { %s41_s28 = smul.f32 %s154_s5, %s150_s1  ;;  %s63_s21 = scalar_lea.hbm %s156_s7, 16 }
   0x2   :  { %s43_s10 = smul.f32 %s152_s3, %s149_s0  ;;  %p64_p0 = scmp.ne.s32.totalorder %s156_s7, %s63_s21 }
   0x3   :  { %s42_s13 = sadd.f32 %s41_s28, %s155_s6  ;;  %p67_p1 = scmp.lt.u32.totalorder %s63_s21, %s156_s7 }
   0x4   :  { %s44_s16 = sadd.f32 %s43_s10, %s153_s4 }
   0x5   :  { %p69_p2 = pnand %p67_p1, %p64_p0 }
   0x6   :  { %s45_s19 = ssub.f32 %s44_s16, %s151_s2 }
   0x8   :  { %s46_s1 = ssub.f32 %s42_s13, %s45_s19 }
   0xa   :  { %48 = sst [smem:[#allocation9]] %s46_s1 }
   0xb   :  { %72 = shalt.err (!%p69_p2)
}
   0xc   :  { %s75_s4 = smov [#allocation9]  }
   0xd   :  { %56 = dma.smem_to_hbm %s75_s4, 16, %s156_s7, [#allocation10]  }
   0xe   :  { %73 = dma.done.wait [#allocation10], 16  }
   0xf   :  { %74 = vsyncadd [#allocation10], 4294967280 }
  0x10   :  { %60 = sfence }
  0x11   :  { %61 = vsyncpa [#allocation10], 1 }

</bundles_post_ra>
